<compile_context>
chip_gen: v7x
topology: tpu7x:2x2x1
jax: 0.10.0
libtpu: 0.0.40
codegen_flags: <defaults>
</compile_context>

<pallas_src>
import functools

import jax
import jax.numpy as jnp
from jax.experimental import pallas as pl
from jax.experimental.pallas import tpu as pltpu

_LANES = 128      # vreg lane width
_SUBLANES = 8     # f32 sublane count


def _round_up(x, m):
    return (x + m - 1) // m * m


@functools.lru_cache(maxsize=1)
def _vmem_budget_bytes():
    """Half of physical VMEM: ~64 MiB on v5e/v6e (128 MiB), ~32 MiB on v7x."""
    cap = 64 * 1024 * 1024  # conservative fallback (valid on every gen)
    try:
        cap = int(pltpu.get_tpu_info().vmem_capacity_bytes)
    except Exception:
        pass
    return min(cap // 2, 96 * 1024 * 1024)


def _pick_tile_rows(B, D, O, O_pad, x_itemsize, w_itemsize, budget):
    """Largest multiple-of-8 batch tile fitting the VMEM budget (cap 1024)."""
    # Resident, single-buffered weight + column-sum + bias.
    resident = D * O_pad * w_itemsize + 2 * O_pad * 4
    # Double-buffered x tile and out tile, plus one f32 (TB, O_pad) intermediate.
    per_row = 2 * D * x_itemsize + 2 * O * x_itemsize + O_pad * 4
    avail = max(budget - resident, per_row * _SUBLANES)
    tb = (avail // per_row) // _SUBLANES * _SUBLANES
    # 512-1024 rows is the measured sweet spot (~85% HBM roofline).
    tb = int(max(_SUBLANES, min(tb, 1024, _round_up(B, _SUBLANES))))
    # Ensure >= 2 grid programs when possible so both v7x TensorCores get work.
    if B >= 2 * _SUBLANES:
        tb = min(tb, _round_up(-(-B // 2), _SUBLANES))
    return tb


def feature_model_kernel(x_ref, w_ref, csum_ref, b_ref, o_ref):
    x = x_ref[...]                                      # (TB, D), input dtype
    xf = x.astype(jnp.float32)
    n = xf.shape[1]

    # Row statistics (XLU reductions) — independent of the MXU matmul below,
    # so the compiler can overlap them. Unbiased N-1 divisor = torch.std.
    s1 = jnp.sum(xf, axis=1, keepdims=True)             # (TB, 1)
    s2 = jnp.sum(xf * xf, axis=1, keepdims=True)        # (TB, 1)
    mean = s1 * (1.0 / n)
    # Clamp guards single-pass cancellation producing a tiny negative var.
    # TODO(synk): compensated / two-pass variance for data with |mean| >> std.
    var = jnp.maximum((s2 - s1 * mean) * (1.0 / (n - 1)), 0.0)
    inv_std = jax.lax.rsqrt(var)                        # EUP slot, ~free
    # No epsilon -> matches torch semantics (constant rows give inf/nan).

    # MXU on raw x (bf16 fast path); normalization folded in afterwards:
    #   ((x - mean)/std) @ W = inv_std*(x@W) - (mean*inv_std)*colsum(W)
    raw = jnp.dot(x.astype(w_ref.dtype), w_ref[...],
                  preferred_element_type=jnp.float32)   # (TB, O_pad) f32
    out = inv_std * raw - (mean * inv_std) * csum_ref[...]
    out = out + b_ref[...]                              # broadcast (1, O_pad)

    # Store only the useful O columns (output array is unpadded -> minimal
    # HBM writeback; when O is already a multiple of 128 this is a no-op).
    o_ref[...] = out[:, : o_ref.shape[1]].astype(o_ref.dtype)


def prepare_feature_model_params(weight, bias, matmul_dtype=jnp.bfloat16):
    """One-time parameter prep (do NOT redo per forward call).

    Transposes the nn.Linear weight to (D, O), zero-pads the output dim to a
    multiple of 128 (clean MXU lane tiles), casts it to `matmul_dtype`
    (default bf16 = MXU-native fast path), and precomputes the f32 column
    sums of that SAME quantized W for the folded-normalization identity.
    """
    O, D = weight.shape
    O_pad = _round_up(O, _LANES)
    w_t = jnp.zeros((D, O_pad), dtype=matmul_dtype)
    w_t = w_t.at[:, :O].set(weight.T.astype(matmul_dtype))
    csum = jnp.sum(w_t.astype(jnp.float32), axis=0, keepdims=True)  # (1, O_pad)
    b2 = jnp.zeros((1, O_pad), dtype=jnp.float32)
    b2 = b2.at[:, :O].set(bias.astype(jnp.float32))
    return w_t, csum, b2


@functools.partial(jax.jit, static_argnames=("out_features",))
def feature_model_forward(x, w_t, csum, b2, out_features):
    """x: (B, D) f32; w_t: (D, O_pad); csum/b2: (1, O_pad) f32. Returns (B, O)."""
    B, D = x.shape
    O = int(out_features)
    O_pad = w_t.shape[1]

    budget = _vmem_budget_bytes()
    TB = _pick_tile_rows(B, D, O, O_pad,
                         x.dtype.itemsize, w_t.dtype.itemsize, budget)
    grid = (pl.cdiv(B, TB),)
    # Ragged tail block: Pallas reads undefined rows / discards OOB writes.
    # All math is strictly row-local, so tail garbage cannot contaminate
    # valid rows (keep it that way — no cross-row reductions).

    cost = pl.CostEstimate(
        flops=2 * B * D * O_pad + 8 * B * D,
        transcendentals=B,                      # one rsqrt per row
        bytes_accessed=(B * D * x.dtype.itemsize
                        + D * O_pad * w_t.dtype.itemsize
                        + 2 * O_pad * 4
                        + B * O * x.dtype.itemsize),
    )

    out = pl.pallas_call(
        feature_model_kernel,
        out_shape=jax.ShapeDtypeStruct((B, O), x.dtype),
        grid=grid,
        in_specs=[
            pl.BlockSpec((TB, D), lambda i: (i, 0)),           # streamed tiles
            pl.BlockSpec((D, O_pad), lambda i: (0, 0),         # resident W
                         pipeline_mode=pl.Buffered(1)),
            pl.BlockSpec((1, O_pad), lambda i: (0, 0),         # resident colsum
                         pipeline_mode=pl.Buffered(1)),
            pl.BlockSpec((1, O_pad), lambda i: (0, 0),         # resident bias
                         pipeline_mode=pl.Buffered(1)),
        ],
        out_specs=pl.BlockSpec((TB, O), lambda i: (i, 0)),     # unpadded out
        compiler_params=pltpu.CompilerParams(
            dimension_semantics=("parallel",),                 # v7x: 2 TCs
            vmem_limit_bytes=budget,
        ),
        cost_estimate=cost,
    )(x, w_t, csum, b2)

    return out


if __name__ == "__main__":
    # Small shapes consistent with the module: x is (batch, input_size).
    batch, input_size, output_size = 8, 32, 16

    key = jax.random.PRNGKey(0)
    kx, kw, kb = jax.random.split(key, 3)

    x = jax.random.normal(kx, (batch, input_size), dtype=jnp.float32)

    # Deterministic nn.Linear-style init: U(-1/sqrt(in), 1/sqrt(in)).
    bound = 1.0 / (input_size ** 0.5)
    weight = jax.random.uniform(kw, (output_size, input_size),
                                minval=-bound, maxval=bound, dtype=jnp.float32)
    bias = jax.random.uniform(kb, (output_size,),
                              minval=-bound, maxval=bound, dtype=jnp.float32)

    # Pure-JAX reference (two-pass unbiased std, matching torch.std default).
    mean = jnp.mean(x, axis=1, keepdims=True)
    std = jnp.sqrt(jnp.sum((x - mean) ** 2, axis=1, keepdims=True)
                   / (input_size - 1))
    ref = ((x - mean) / std) @ weight.T + bias

    # 1) f32 MXU path: tight correctness check.
    w32, c32, b32 = prepare_feature_model_params(weight, bias,
                                                 matmul_dtype=jnp.float32)
    out32 = jax.block_until_ready(
        feature_model_forward(x, w32, c32, b32, output_size))
    assert out32.shape == (batch, output_size), out32.shape
    assert jnp.allclose(out32, ref, atol=1e-4, rtol=1e-4), "f32 path mismatch"

    # 2) Default bf16 MXU fast path: looser tolerance (bf16 operands, f32 acc).
    wbf, cbf, bbf = prepare_feature_model_params(weight, bias)
    outbf = jax.block_until_ready(
        feature_model_forward(x, wbf, cbf, bbf, output_size))
    assert outbf.shape == (batch, output_size), outbf.shape
    assert jnp.allclose(outbf, ref, atol=5e-2, rtol=5e-2), "bf16 path mismatch"

    print("KERNEL_OK")
</pallas_src>

<mosaic_0001>
module attributes {stable_mosaic.version = 11 : i64} {
  func.func @feature_model_kernel(%arg0: i32, %arg1: memref<8x32xf32, #tpu.memory_space<vmem>>, %arg2: memref<32x128xf32, #tpu.memory_space<vmem>>, %arg3: memref<1x128xf32, #tpu.memory_space<vmem>>, %arg4: memref<1x128xf32, #tpu.memory_space<vmem>>, %arg5: memref<8x16xf32, #tpu.memory_space<vmem>>) attributes {dimension_semantics = [#tpu.dimension_semantics<parallel>], iteration_bounds = array<i64: 1>, scalar_prefetch = 0 : i64, scratch_operands = 0 : i64, tpu.core_type = #tpu.core_type<tc>, window_params = [{transform_indices = @transform_0, window_bounds = array<i64: 8, 32>}, {pipeline_mode = #tpu.pipeline_mode<synchronous>, transform_indices = @transform_1, window_bounds = array<i64: 32, 128>}, {pipeline_mode = #tpu.pipeline_mode<synchronous>, transform_indices = @transform_2, window_bounds = array<i64: 1, 128>}, {pipeline_mode = #tpu.pipeline_mode<synchronous>, transform_indices = @transform_3, window_bounds = array<i64: 1, 128>}, {transform_indices = @transform_4, window_bounds = array<i64: 8, 16>}]} {
    %c0 = arith.constant 0 : index
    %c0_0 = arith.constant 0 : index
    %0 = vector.load %arg1[%c0, %c0_0] : memref<8x32xf32, #tpu.memory_space<vmem>>, vector<8x32xf32>
    %cst = arith.constant dense<0.000000e+00> : vector<8xf32>
    %1 = vector.multi_reduction <add>, %0, %cst [1] : vector<8x32xf32> to vector<8xf32>
    %2 = vector.shape_cast %1 : vector<8xf32> to vector<8x1xf32>
    %3 = arith.mulf %0, %0 : vector<8x32xf32>
    %cst_1 = arith.constant dense<0.000000e+00> : vector<8xf32>
    %4 = vector.multi_reduction <add>, %3, %cst_1 [1] : vector<8x32xf32> to vector<8xf32>
    %5 = vector.shape_cast %4 : vector<8xf32> to vector<8x1xf32>
    %cst_2 = arith.constant 3.125000e-02 : f32
    %6 = vector.broadcast %cst_2 : f32 to vector<8x1xf32>
    %7 = arith.mulf %2, %6 : vector<8x1xf32>
    %8 = arith.mulf %2, %7 : vector<8x1xf32>
    %9 = arith.subf %5, %8 : vector<8x1xf32>
    %cst_3 = arith.constant 0.0322580636 : f32
    %10 = vector.broadcast %cst_3 : f32 to vector<8x1xf32>
    %11 = arith.mulf %9, %10 : vector<8x1xf32>
    %cst_4 = arith.constant 0.000000e+00 : f32
    %12 = vector.broadcast %cst_4 : f32 to vector<8x1xf32>
    %13 = arith.maximumf %11, %12 : vector<8x1xf32>
    %14 = math.rsqrt %13 : vector<8x1xf32>
    %c0_5 = arith.constant 0 : index
    %c0_6 = arith.constant 0 : index
    %15 = vector.load %arg2[%c0_5, %c0_6] : memref<32x128xf32, #tpu.memory_space<vmem>>, vector<32x128xf32>
    %cst_7 = arith.constant dense<0.000000e+00> : vector<8x128xf32>
    %16 = tpu.matmul %0, %15, %cst_7 {dimension_numbers = #tpu.dot_dimension_numbers<[1], [0], [0], [1], [0, 0, 1, 1], [], []>} : vector<8x32xf32>, vector<32x128xf32>, vector<8x128xf32> -> vector<8x128xf32>
    %17 = vector.broadcast %14 : vector<8x1xf32> to vector<8x128xf32>
    %18 = arith.mulf %17, %16 : vector<8x128xf32>
    %19 = arith.mulf %7, %14 : vector<8x1xf32>
    %c0_8 = arith.constant 0 : index
    %c0_9 = arith.constant 0 : index
    %20 = vector.load %arg3[%c0_8, %c0_9] : memref<1x128xf32, #tpu.memory_space<vmem>>, vector<1x128xf32>
    %21 = vector.broadcast %19 : vector<8x1xf32> to vector<8x128xf32>
    %22 = vector.broadcast %20 : vector<1x128xf32> to vector<8x128xf32>
    %23 = arith.mulf %21, %22 : vector<8x128xf32>
    %24 = arith.subf %18, %23 : vector<8x128xf32>
    %c0_10 = arith.constant 0 : index
    %c0_11 = arith.constant 0 : index
    %25 = vector.load %arg4[%c0_10, %c0_11] : memref<1x128xf32, #tpu.memory_space<vmem>>, vector<1x128xf32>
    %26 = vector.broadcast %25 : vector<1x128xf32> to vector<8x128xf32>
    %27 = arith.addf %24, %26 : vector<8x128xf32>
    %28 = vector.extract_strided_slice %27 {offsets = [0, 0], sizes = [8, 16], strides = [1, 1]} : vector<8x128xf32> to vector<8x16xf32>
    %c0_12 = arith.constant 0 : index
    %c0_13 = arith.constant 0 : index
    %29 = vector.load %arg5[%c0_12, %c0_13] : memref<8x16xf32, #tpu.memory_space<vmem>>, vector<8x16xf32>
    tpu.vector_store %arg5[%c0_12, %c0_13], %28 {strides = array<i32>} : memref<8x16xf32, #tpu.memory_space<vmem>>, vector<8x16xf32>,
    return
  }
  func.func @transform_0(%arg0: i32) -> (i32, i32) {
    %c0_i32 = arith.constant 0 : i32
    %c0_i32_0 = arith.constant 0 : i32
    return %arg0, %c0_i32 : i32, i32
  }
  func.func @transform_1(%arg0: i32) -> (i32, i32) {
    %c0_i32 = arith.constant 0 : i32
    %c0_i32_0 = arith.constant 0 : i32
    %c0_i32_1 = arith.constant 0 : i32
    return %c0_i32, %c0_i32_0 : i32, i32
  }
  func.func @transform_2(%arg0: i32) -> (i32, i32) {
    %c0_i32 = arith.constant 0 : i32
    %c0_i32_0 = arith.constant 0 : i32
    %c0_i32_1 = arith.constant 0 : i32
    return %c0_i32, %c0_i32_0 : i32, i32
  }
  func.func @transform_3(%arg0: i32) -> (i32, i32) {
    %c0_i32 = arith.constant 0 : i32
    %c0_i32_0 = arith.constant 0 : i32
    %c0_i32_1 = arith.constant 0 : i32
    return %c0_i32, %c0_i32_0 : i32, i32
  }
  func.func @transform_4(%arg0: i32) -> (i32, i32) {
    %c0_i32 = arith.constant 0 : i32
    %c0_i32_0 = arith.constant 0 : i32
    return %arg0, %c0_i32 : i32, i32
  }
}

</mosaic_0001>

<bundles_post_ra>
// kernel: feature_model_forward.1
= control target key start
LH: loop header
LB: loop body
LE: loop exit
PB: predicated region body
PF: predicated region fallthrough
CT: control target
= control target key end

     0   :  { %9 = vsyncpa [#allocation3], 0  ;;  %s362_s0 = inlined_call_operand.hbm [shape: f32[8,32], index: 0, kind: input, shape index: {}]   ;;  %s363_s1 = inlined_call_operand.hbm [shape: f32[32,128], index: 1, kind: input, shape index: {}]   ;;  %s364_s2 = inlined_call_operand.vmem [shape: f32[1,128], index: 2, kind: input, shape index: {}]   ;;  %s365_s3 = inlined_call_operand.vmem [shape: f32[1,128], index: 3, kind: input, shape index: {}]   ;;  %s366_s4 = inlined_call_operand.hbm [shape: f32[8,16], index: 4, kind: output, shape index: {}]  }
   0x1   :  { %10 = vsyncpa [#allocation6], 0 }
   0x2   :  { %11 = vsyncpa [#allocation4], 0  ;;  %s280_s15 = smov [#allocation2]   ;;  %s281_s17 = smov [#allocation5]  }
   0x3   :  { %s18_s16 = sshll.u32 %s280_s15, 4  ;;  %s27_s18 = sshll.u32 %s281_s17, 4  ;;  %s19_s16 = int_to_ptr.vmem [resolvable:$true] %s18_s16  ;;  %s313_s18 = int_to_ptr.vmem [resolvable:$true] %s27_s18 }
   0x4   :  { %s208_s21 = scalar_lea.hbm %s362_s0, 128 }
   0x5   :  { %p209_p0 = scmp.ne.s32.totalorder %s362_s0, %s208_s21  ;;  %p212_p1 = scmp.lt.u32.totalorder %s208_s21, %s362_s0 }
   0x7   :  { %p214_p2 = pnand %p212_p1, %p209_p0 }
   0x9   :  { %217 = shalt.err (!%p214_p2)
}
   0xa   :  { %s218_s26 = scalar_lea.vmem %s19_s16, 128  ;;  %p223_p4 = scmp.lt.s32.totalorder %s19_s16, %s19_s16 }
   0xb   :  { %p219_p3 = scmp.ne.s32.totalorder %s19_s16, %s218_s26  ;;  %p224_p5 = scmp.lt.s32.totalorder %s218_s26, %s218_s26 }
   0xd   :  { %p225_p6 = por %p224_p5, %p223_p4 }
   0xf   :  { %p226_p7 = pnand %p225_p6, %p219_p3 }
  0x11   :  { %229 = shalt.err (!%p226_p7)
}
  0x12   :  { %21 = dma.hbm_to_vmem [thread:$0]  %s362_s0, 128, %s19_s16, [#allocation3]  }
  0x13   :  { %s230_s5 = scalar_lea.hbm %s363_s1, 512 }
  0x14   :  { %p231_p8 = scmp.ne.s32.totalorder %s363_s1, %s230_s5  ;;  %p234_p9 = scmp.lt.u32.totalorder %s230_s5, %s363_s1 }
  0x16   :  { %p236_p10 = pnand %p234_p9, %p231_p8 }
  0x18   :  { %239 = shalt.err (!%p236_p10)
}
  0x19   :  { %s240_s10 = scalar_lea.vmem %s313_s18, 512  ;;  %p245_p12 = scmp.lt.s32.totalorder %s313_s18, %s313_s18 }
  0x1a   :  { %p241_p11 = scmp.ne.s32.totalorder %s313_s18, %s240_s10  ;;  %p246_p13 = scmp.lt.s32.totalorder %s240_s10, %s240_s10 }
  0x1c   :  { %p247_p0 = por %p246_p13, %p245_p12 }
  0x1e   :  { %p248_p1 = pnand %p247_p0, %p241_p11 }
  0x20   :  { %251 = shalt.err (!%p248_p1)
}
  0x21   :  { %s282_s0 = smov 128   ;;  %s283_s11 = smov 8  }
  0x22   :  { %33 = dma.hbm_to_vmem [thread:$0]  %s363_s1, 512, %s313_s18, [#allocation6], %s282_s0, %s282_s0, %s283_s11  }
  0x23   :  { %274 = dma.done.wait [#allocation3], 128  }
  0x24   :  { %275 = vsyncadd [#allocation3], 4294967168 }
  0x25   :  { %276 = dma.done.wait [#allocation6], 512  }
  0x26   :  { %277 = vsyncadd [#allocation6], 4294966784  ;;  %v284_v0 = vmov 0.0|0.0   ;;  %vm285_vm0 = vmmov 0   ;;  %v286_v1 = vmov 0.0   ;;  %v59_v2 = vld [vmem:[#allocation5] sm:$0xff] }
  0x27   :  { %192 = vmatprep.subr.bf16.mxu0 %v284_v0  ;;  %189 = vmatprep.mubr.msk.f32.mxu0 %vm285_vm0, %v286_v1  ;;  %v60_v3 = vld [vmem:[#allocation5 + $0x8] sm:$0xff]  ;;  %v61_v4 = vld [vmem:[#allocation5 + $0x10] sm:$0xff]  ;;  %v62_v6 = vld [vmem:[#allocation5 + $0x18] sm:$0xff]  ;;  %vm45_vm1 = vcmask 261120   ;;  %s287_s17 = smov [#allocation7]   ;;  %vm155_vm2 = vcmask 130048  }
  0x28   :  { %v193_v5 = vpack.c.bf16 %v60_v3, %v59_v2  ;;  %v44_v7 = vld [vmem:[#allocation2] sm:$0xff]  ;;  %v196_v10 = vpack.c.bf16 %v62_v6, %v61_v4  ;;  %s163_s18 = sshll.u32 %s287_s17, 4  ;;  %s164_s18 = int_to_ptr.vmem [resolvable:$true] %s163_s18 }
  0x29   :  { %v46_v8 = vsel %vm45_vm1, %v44_v7, 0.0  ;;  %v49_v9 = vmul.f32 %v44_v7, %v44_v7  ;;  %v174_v21 = vld [vmem:[%s364_s2] ss:$0 sm:$0xff]  ;;  %s252_s19 = scalar_lea.vmem %s164_s18, 128  ;;  %p257_p3 = scmp.lt.s32.totalorder %s164_s18, %s164_s18 }
  0x2a   :  { %194 = vmatpush3.bf16.msra.mxu0 %v193_v5  ;;  %47 = vadd.xlane.f32.xlu0 %v46_v8  ;;  %v175_v26 = vld [vmem:[%s365_s3] ss:$0 sm:$0xff]  ;;  %p253_p2 = scmp.ne.s32.totalorder %s164_s18, %s252_s19  ;;  %p258_p4 = scmp.lt.s32.totalorder %s252_s19, %s252_s19 }
  0x2b   :  { %195 = vmatprep.subr.bf16.mxu0 %v284_v0  ;;  %v50_v11 = vsel %vm45_vm1, %v49_v9, 0.0 }
  0x2c   :  { %p259_p5 = por %p258_p4, %p257_p3 }
  0x2e   :  { %197 = vmatpush3.bf16.msra.mxu0 %v196_v10  ;;  %51 = vadd.xlane.f32.xlu0 %v50_v11  ;;  %p260_p6 = pnand %p259_p5, %p253_p2 }
  0x31   :  { %190 = vmatmul.mubr.msk.f32.vlgmr.msra.gmra.mrb[0].mxu0 %vm45_vm1, %v44_v7 }
  0xb7   :  { %v48_v12 = vpop.xlane.xlu0 %47 }
  0xb8   :  { %v53_v13 = vmul.f32 0.03125, %v48_v12 }
  0xba   :  { %v54_v14 = vmul.f32 %v53_v13, %v48_v12 }
  0xbb   :  { %v52_v15 = vpop.xlane.xlu0 %51 }
  0xbc   :  { %v55_v16 = vsub.f32 %v52_v15, %v54_v14 }
  0xbe   :  { %v56_v17 = vmul.f32 0.032258064, %v55_v16 }
  0xc0   :  { %v57_v18 = vmax.f32 %v56_v17, 0.0 }
  0xc2   :  { %206 = vrsqrt.f32 %v57_v18 }
  0xcc   :  { %v207_v19 = vpop.eup %206 }
  0xcd   :  { %v137_v20 = vmul.f32 %v207_v19, %v53_v13 }
  0xcf   :  { %v145_v24 = vmul.f32 %v174_v21, %v137_v20 }
 0x104   :  { %v132_v22 = vpop.f32.mrb[0].mxu0 }
 0x105   :  { %v136_v23 = vmul.f32 %v207_v19, %v132_v22  ;;  %v191_v25 = vpop.f32.mrb[1].mxu0 }
 0x107   :  { %v146_v27 = vsub.f32 %v136_v23, %v145_v24 }
 0x109   :  { %v154_v28 = vadd.f32 %v175_v26, %v146_v27 }
 0x10b   :  { %156 = vst.msk [vmem:[#allocation7] sm:$0xff] %vm155_vm2, %v154_v28 }
 0x10c   :  { %263 = shalt.err (!%p260_p6)
}
 0x10d   :  { %s264_s21 = scalar_lea.hbm %s366_s4, 128 }
 0x10e   :  { %p265_p7 = scmp.ne.s32.totalorder %s366_s4, %s264_s21  ;;  %p268_p8 = scmp.lt.u32.totalorder %s264_s21, %s366_s4 }
 0x110   :  { %p270_p9 = pnand %p268_p8, %p265_p7 }
 0x112   :  { %273 = shalt.err (!%p270_p9)
}
 0x113   :  { %166 = dma.vmem_to_hbm [thread:$0]  %s164_s18, 128, %s366_s4, [#allocation4]  }
 0x114   :  { %278 = dma.done.wait [#allocation4], 128  }
 0x115   :  { %279 = vsyncadd [#allocation4], 4294967168 }
 0x116   :  { %170 = vsyncpa [#allocation3], 1 }
 0x117   :  { %171 = vsyncpa [#allocation6], 1 }
 0x118   :  { %172 = vsyncpa [#allocation4], 1 }

</bundles_post_ra>
